<compile_context>
chip_gen: v7x
topology: tpu7x:2x2x1
jax: 0.10.0
libtpu: 0.0.40
codegen_flags: <defaults>
</compile_context>

<pallas_src>
import functools

import jax
import jax.numpy as jnp
import numpy as np
from jax import lax
from jax.experimental import pallas as pl
from jax.experimental.pallas import tpu as pltpu


def _margin_kernel(c1s_ref, c2s_ref, x_ref, clus_col_ref, clus_row_ref, o_ref,
                   *, pairs_per_chunk, k):
    chunk = pl.program_id(0)
    PC = pairs_per_chunk
    INF = jnp.float32(jnp.inf)

    x = x_ref[...].astype(jnp.float32)                              # (N, D)
    N = x.shape[0]

    # Squared pairwise distances: MXU Gram matrix + VPU adds.
    gram = lax.dot_general(x, x, dimension_numbers=(((1,), (1,)), ((), ())),
                           preferred_element_type=jnp.float32)      # (N, N)
    r = jnp.sum(x * x, axis=1, keepdims=True)                       # (N, 1)
    dist = r - 2.0 * gram + r.T                                     # (N, N)

    clus_col = clus_col_ref[...]                                    # (N, 1) int32
    clus_row = clus_row_ref[...]                                    # (1, N) int32

    # Batched masked-distance tensor for this chunk's pairs.  Padded pairs use
    # cluster id -1, which matches nothing -> all-INF slice -> contributes 0,
    # exactly like the empty-cluster skip in the reference.
    pair_ids = lax.broadcasted_iota(jnp.int32, (PC, N, N), 0)
    masked = jnp.full((PC, N, N), INF, dtype=jnp.float32)
    base = chunk * PC
    for p in range(PC):                                             # PC is static & tiny
        c1 = c1s_ref[base + p]
        c2 = c2s_ref[base + p]
        # rows: cluster c2 (xyz2), cols: cluster c1 (xyz1)
        pmask = (clus_col == c2) & (clus_row == c1)                 # (N, N)
        masked = jnp.where(pair_ids == p,
                           jnp.where(pmask, dist, INF)[None, :, :],
                           masked)

    row_ids3 = lax.broadcasted_iota(jnp.int32, (PC, N, N), 1)
    col_ids3 = lax.broadcasted_iota(jnp.int32, (PC, N, N), 2)
    row_ids2 = lax.broadcasted_iota(jnp.int32, (PC, N), 1)

    psum = jnp.float32(0.0)
    for _ in range(k):                                              # k is small & static
        # Two-stage argmin (per-row min, per-row arg-col, then tiny reduces);
        # tie-break = smallest flat index, matching np.argmin first-occurrence.
        row_min = jnp.min(masked, axis=2)                                       # (PC, N)
        row_argcol = jnp.min(
            jnp.where(masked == row_min[:, :, None], col_ids3, N), axis=2)      # (PC, N)
        minval = jnp.min(row_min, axis=1, keepdims=True)                        # (PC, 1)
        sel_row = jnp.min(
            jnp.where(row_min == minval, row_ids2, N), axis=1, keepdims=True)   # (PC, 1)
        sel_col = jnp.min(
            jnp.where(row_ids2 == sel_row, row_argcol, N), axis=1, keepdims=True)  # (PC, 1)
        valid = minval < INF                    # replaces the per-pick jnp.any(mask)
        psum = psum + jnp.sum(jnp.where(valid, 1.0 / minval, 0.0))
        # Punch out the selected row & column.  When a pair is exhausted its
        # slice is already all-INF, so the (0,0) fallback pick is harmless.
        punch = ((row_ids3 == sel_row[:, :, None]) |
                 (col_ids3 == sel_col[:, :, None]))
        masked = jnp.where(punch, INF, masked)

    # Lane-dense (8,128) output block per chunk; the wrapper reduces.
    o_ref[...] = jnp.full((1, 8, 128), psum, dtype=jnp.float32)


def margin_loss(x_flat, clustering, num_of_clus, k, *, num_chunks=2):
    N, D = x_flat.shape
    clus = clustering.astype(jnp.int32)
    clus_col = clus.reshape(N, 1)
    clus_row = clus.reshape(1, N)

    # Static (c1, c2) pair table with c2 > c1 (the only pairs that contribute).
    pairs = [(c1, c2) for c1 in range(num_of_clus) for c2 in range(c1 + 1, num_of_clus)]
    P = len(pairs)
    if P == 0:
        return jnp.float32(0.0)
    num_chunks = max(1, min(num_chunks, P))
    PC = -(-P // num_chunks)                  # ceil(P / num_chunks)
    P_pad = num_chunks * PC
    c1s = np.full((P_pad,), -1, dtype=np.int32)
    c2s = np.full((P_pad,), -1, dtype=np.int32)
    for i, (a, b) in enumerate(pairs):
        c1s[i], c2s[i] = a, b

    kernel = functools.partial(_margin_kernel, pairs_per_chunk=PC, k=k)
    out = pl.pallas_call(
        kernel,
        out_shape=jax.ShapeDtypeStruct((num_chunks, 8, 128), jnp.float32),
        grid_spec=pltpu.PrefetchScalarGridSpec(
            num_scalar_prefetch=2,            # c1s, c2s land in SMEM
            grid=(num_chunks,),
            in_specs=[
                pl.BlockSpec((N, D), lambda i, *_: (0, 0)),
                pl.BlockSpec((N, 1), lambda i, *_: (0, 0)),
                pl.BlockSpec((1, N), lambda i, *_: (0, 0)),
            ],
            out_specs=pl.BlockSpec((1, 8, 128), lambda i, *_: (i, 0, 0)),
        ),
        compiler_params=pltpu.CompilerParams(
            dimension_semantics=("parallel",)),   # shard pair-chunks across v7x TCs
    )(jnp.asarray(c1s), jnp.asarray(c2s),
      x_flat.astype(jnp.float32), clus_col, clus_row)

    total = jnp.sum(out[:, 0, 0])
    return total / jnp.float32(num_of_clus) / jnp.float32(k)


def reference_margin(x_flat, clustering, num_of_clus, k):
    """Pure numpy re-implementation of the PyTorch forward (for verification)."""
    x = np.asarray(x_flat, dtype=np.float32)
    c = np.asarray(clustering)
    loss = 0.0
    for num in range(num_of_clus):
        a = x[c == num]
        if len(a) == 0:
            continue
        for another in range(num_of_clus):
            if another != num and another > num:
                b = x[c == another]
                if len(b) == 0:
                    continue
                ra = np.sum(a * a, axis=1)
                rb = np.sum(b * b, axis=1)
                dist = rb[:, None] - 2.0 * (b @ a.T) + ra[None, :]
                s = 0.0
                for _ in range(k):
                    if dist.size == 0:
                        break
                    idx = int(np.argmin(dist))
                    cols = dist.shape[1]
                    i, j = idx // cols, idx % cols
                    s += 1.0 / dist[i, j]
                    dist = np.delete(np.delete(dist, i, 0), j, 1)
                loss += s
    return loss / num_of_clus / k


if __name__ == "__main__":
    key = jax.random.PRNGKey(0)
    kx, kc = jax.random.split(key)

    # small NCHW-style input; the forward only uses the flattened feature dim
    N, C, H, W = 16, 4, 4, 2
    num_of_clus, k = 3, 2

    x = jax.random.normal(kx, (N, C, H, W), dtype=jnp.float32)
    clustering = jax.random.randint(kc, (N,), 0, num_of_clus, dtype=jnp.int32)

    x_flat = x.reshape(N, -1)  # matches points.view(1, len, -1) flattening

    out = margin_loss(x_flat, clustering, num_of_clus, k)
    out = jax.block_until_ready(out)

    ref = reference_margin(np.asarray(x_flat), np.asarray(clustering), num_of_clus, k)
    assert jnp.isfinite(out), "non-finite loss"
    assert abs(float(out) - float(ref)) <= 5e-2 * max(1.0, abs(float(ref))), (
        float(out),
        float(ref),
    )
    print("KERNEL_OK")
</pallas_src>

<mosaic_0001>
module attributes {stable_mosaic.version = 11 : i64} {
  func.func @_margin_kernel(%arg0: i32, %arg1: memref<4xi32, #tpu.memory_space<smem>>, %arg2: memref<4xi32, #tpu.memory_space<smem>>, %arg3: memref<16x32xf32, #tpu.memory_space<vmem>>, %arg4: memref<16x1xi32, #tpu.memory_space<vmem>>, %arg5: memref<1x16xi32, #tpu.memory_space<vmem>>, %arg6: memref<1x8x128xf32, #tpu.memory_space<vmem>>) attributes {dimension_semantics = [#tpu.dimension_semantics<parallel>], iteration_bounds = array<i64: 2>, scalar_prefetch = 2 : i64, scratch_operands = 0 : i64, tpu.core_type = #tpu.core_type<tc>, window_params = [{pipeline_mode = #tpu.pipeline_mode<synchronous>, transform_indices = @transform_0, window_bounds = array<i64: 16, 32>}, {pipeline_mode = #tpu.pipeline_mode<synchronous>, transform_indices = @transform_1, window_bounds = array<i64: 16, 1>}, {pipeline_mode = #tpu.pipeline_mode<synchronous>, transform_indices = @transform_2, window_bounds = array<i64: 1, 16>}, {transform_indices = @transform_3, window_bounds = array<i64: 1, 8, 128>}]} {
    %c0 = arith.constant 0 : index
    %c0_0 = arith.constant 0 : index
    %0 = vector.load %arg3[%c0, %c0_0] : memref<16x32xf32, #tpu.memory_space<vmem>>, vector<16x32xf32>
    %cst = arith.constant dense<0.000000e+00> : vector<16x16xf32>
    %1 = tpu.matmul %0, %0, %cst {dimension_numbers = #tpu.dot_dimension_numbers<[1], [1], [0], [0], [0, 0, 1, 0], [], []>} : vector<16x32xf32>, vector<16x32xf32>, vector<16x16xf32> -> vector<16x16xf32>
    %2 = arith.mulf %0, %0 : vector<16x32xf32>
    %cst_1 = arith.constant dense<0.000000e+00> : vector<16xf32>
    %3 = vector.multi_reduction <add>, %2, %cst_1 [1] : vector<16x32xf32> to vector<16xf32>
    %4 = vector.shape_cast %3 : vector<16xf32> to vector<16x1xf32>
    %cst_2 = arith.constant 2.000000e+00 : f32
    %5 = vector.broadcast %cst_2 : f32 to vector<16x16xf32>
    %6 = arith.mulf %5, %1 : vector<16x16xf32>
    %7 = vector.broadcast %4 : vector<16x1xf32> to vector<16x16xf32>
    %8 = arith.subf %7, %6 : vector<16x16xf32>
    %9 = tpu.transpose %4, [1, 0] : vector<16x1xf32> -> vector<1x16xf32>
    %10 = vector.broadcast %9 : vector<1x16xf32> to vector<16x16xf32>
    %11 = arith.addf %8, %10 : vector<16x16xf32>
    %c0_3 = arith.constant 0 : index
    %c0_4 = arith.constant 0 : index
    %12 = vector.load %arg4[%c0_3, %c0_4] : memref<16x1xi32, #tpu.memory_space<vmem>>, vector<16x1xi32>
    %c0_5 = arith.constant 0 : index
    %c0_6 = arith.constant 0 : index
    %13 = vector.load %arg5[%c0_5, %c0_6] : memref<1x16xi32, #tpu.memory_space<vmem>>, vector<1x16xi32>
    %14 = tpu.iota {dimensions = array<i32: 0>} : vector<2x16x16xi32>
    %cst_7 = arith.constant 0x7F800000 : f32
    %15 = vector.broadcast %cst_7 : f32 to vector<2x16x16xf32>
    %c2_i32 = arith.constant 2 : i32
    %16 = arith.muli %arg0, %c2_i32 : i32
    %c0_i32 = arith.constant 0 : i32
    %17 = arith.addi %16, %c0_i32 : i32
    %18 = arith.index_cast %17 : i32 to index
    %19 = memref.load %arg1[%18] : memref<4xi32, #tpu.memory_space<smem>>
    %c0_i32_8 = arith.constant 0 : i32
    %20 = arith.addi %16, %c0_i32_8 : i32
    %21 = arith.index_cast %20 : i32 to index
    %22 = memref.load %arg2[%21] : memref<4xi32, #tpu.memory_space<smem>>
    %23 = vector.broadcast %22 : i32 to vector<16x1xi32>
    %24 = arith.cmpi eq, %12, %23 : vector<16x1xi32>
    %25 = vector.broadcast %19 : i32 to vector<1x16xi32>
    %26 = arith.cmpi eq, %13, %25 : vector<1x16xi32>
    %27 = vector.broadcast %24 : vector<16x1xi1> to vector<16x16xi1>
    %28 = vector.broadcast %26 : vector<1x16xi1> to vector<16x16xi1>
    %29 = arith.andi %27, %28 : vector<16x16xi1>
    %c0_i32_9 = arith.constant 0 : i32
    %30 = vector.broadcast %c0_i32_9 : i32 to vector<2x16x16xi32>
    %31 = arith.cmpi eq, %14, %30 : vector<2x16x16xi32>
    %cst_10 = arith.constant 0x7F800000 : f32
    %32 = vector.broadcast %cst_10 : f32 to vector<16x16xf32>
    %33 = arith.select %29, %11, %32 : vector<16x16xi1>, vector<16x16xf32>
    %34 = vector.shape_cast %33 : vector<16x16xf32> to vector<1x16x16xf32>
    %35 = vector.shape_cast %34 : vector<1x16x16xf32> to vector<1x16x16xf32>
    %36 = vector.broadcast %35 : vector<1x16x16xf32> to vector<2x16x16xf32>
    %37 = arith.select %31, %36, %15 : vector<2x16x16xi1>, vector<2x16x16xf32>
    %c1_i32 = arith.constant 1 : i32
    %38 = arith.addi %16, %c1_i32 : i32
    %39 = arith.index_cast %38 : i32 to index
    %40 = memref.load %arg1[%39] : memref<4xi32, #tpu.memory_space<smem>>
    %c1_i32_11 = arith.constant 1 : i32
    %41 = arith.addi %16, %c1_i32_11 : i32
    %42 = arith.index_cast %41 : i32 to index
    %43 = memref.load %arg2[%42] : memref<4xi32, #tpu.memory_space<smem>>
    %44 = vector.broadcast %43 : i32 to vector<16x1xi32>
    %45 = arith.cmpi eq, %12, %44 : vector<16x1xi32>
    %46 = vector.broadcast %40 : i32 to vector<1x16xi32>
    %47 = arith.cmpi eq, %13, %46 : vector<1x16xi32>
    %48 = vector.broadcast %45 : vector<16x1xi1> to vector<16x16xi1>
    %49 = vector.broadcast %47 : vector<1x16xi1> to vector<16x16xi1>
    %50 = arith.andi %48, %49 : vector<16x16xi1>
    %c1_i32_12 = arith.constant 1 : i32
    %51 = vector.broadcast %c1_i32_12 : i32 to vector<2x16x16xi32>
    %52 = arith.cmpi eq, %14, %51 : vector<2x16x16xi32>
    %cst_13 = arith.constant 0x7F800000 : f32
    %53 = vector.broadcast %cst_13 : f32 to vector<16x16xf32>
    %54 = arith.select %50, %11, %53 : vector<16x16xi1>, vector<16x16xf32>
    %55 = vector.shape_cast %54 : vector<16x16xf32> to vector<1x16x16xf32>
    %56 = vector.shape_cast %55 : vector<1x16x16xf32> to vector<1x16x16xf32>
    %57 = vector.broadcast %56 : vector<1x16x16xf32> to vector<2x16x16xf32>
    %58 = arith.select %52, %57, %37 : vector<2x16x16xi1>, vector<2x16x16xf32>
    %59 = tpu.iota {dimensions = array<i32: 1>} : vector<2x16x16xi32>
    %60 = tpu.iota {dimensions = array<i32: 2>} : vector<2x16x16xi32>
    %61 = tpu.iota {dimensions = array<i32: 1>} : vector<2x16xi32>
    %cst_14 = arith.constant dense<0x7F800000> : vector<2x16xf32>
    %62 = vector.multi_reduction <minimumf>, %58, %cst_14 [2] : vector<2x16x16xf32> to vector<2x16xf32>
    %63 = vector.shape_cast %62 : vector<2x16xf32> to vector<2x16x1xf32>
    %64 = vector.broadcast %63 : vector<2x16x1xf32> to vector<2x16x16xf32>
    %65 = arith.cmpf oeq, %58, %64 : vector<2x16x16xf32>
    %c16_i32 = arith.constant 16 : i32
    %66 = vector.broadcast %c16_i32 : i32 to vector<2x16x16xi32>
    %67 = arith.select %65, %60, %66 : vector<2x16x16xi1>, vector<2x16x16xi32>
    %cst_15 = arith.constant dense<2147483647> : vector<2x16xi32>
    %68 = vector.multi_reduction <minsi>, %67, %cst_15 [2] : vector<2x16x16xi32> to vector<2x16xi32>
    %cst_16 = arith.constant dense<0x7F800000> : vector<2xf32>
    %69 = vector.multi_reduction <minimumf>, %62, %cst_16 [1] : vector<2x16xf32> to vector<2xf32>
    %70 = vector.shape_cast %69 : vector<2xf32> to vector<2x1xf32>
    %71 = vector.broadcast %70 : vector<2x1xf32> to vector<2x16xf32>
    %72 = arith.cmpf oeq, %62, %71 : vector<2x16xf32>
    %c16_i32_17 = arith.constant 16 : i32
    %73 = vector.broadcast %c16_i32_17 : i32 to vector<2x16xi32>
    %74 = arith.select %72, %61, %73 : vector<2x16xi1>, vector<2x16xi32>
    %cst_18 = arith.constant dense<2147483647> : vector<2xi32>
    %75 = vector.multi_reduction <minsi>, %74, %cst_18 [1] : vector<2x16xi32> to vector<2xi32>
    %76 = vector.shape_cast %75 : vector<2xi32> to vector<2x1xi32>
    %77 = vector.broadcast %76 : vector<2x1xi32> to vector<2x16xi32>
    %78 = arith.cmpi eq, %61, %77 : vector<2x16xi32>
    %c16_i32_19 = arith.constant 16 : i32
    %79 = vector.broadcast %c16_i32_19 : i32 to vector<2x16xi32>
    %80 = arith.select %78, %68, %79 : vector<2x16xi1>, vector<2x16xi32>
    %cst_20 = arith.constant dense<2147483647> : vector<2xi32>
    %81 = vector.multi_reduction <minsi>, %80, %cst_20 [1] : vector<2x16xi32> to vector<2xi32>
    %82 = vector.shape_cast %81 : vector<2xi32> to vector<2x1xi32>
    %cst_21 = arith.constant 0x7F800000 : f32
    %83 = vector.broadcast %cst_21 : f32 to vector<2x1xf32>
    %84 = arith.cmpf olt, %70, %83 : vector<2x1xf32>
    %cst_22 = arith.constant 1.000000e+00 : f32
    %85 = vector.broadcast %cst_22 : f32 to vector<2x1xf32>
    %86 = arith.divf %85, %70 : vector<2x1xf32>
    %cst_23 = arith.constant 0.000000e+00 : f32
    %87 = vector.broadcast %cst_23 : f32 to vector<2x1xf32>
    %88 = arith.select %84, %86, %87 : vector<2x1xi1>, vector<2x1xf32>
    %89 = vector.shape_cast %88 : vector<2x1xf32> to vector<1x2x1xf32>
    %cst_24 = arith.constant dense<0.000000e+00> : vector<1xf32>
    %90 = vector.multi_reduction <add>, %89, %cst_24 [1, 2] : vector<1x2x1xf32> to vector<1xf32>
    %91 = vector.shape_cast %90 : vector<1xf32> to vector<1x1x1xf32>
    %92 = vector.extract %91[0, 0, 0] : f32 from vector<1x1x1xf32>
    %cst_25 = arith.constant 0.000000e+00 : f32
    %93 = arith.addf %cst_25, %92 : f32
    %94 = vector.shape_cast %76 : vector<2x1xi32> to vector<2x1x1xi32>
    %95 = vector.broadcast %94 : vector<2x1x1xi32> to vector<2x16x16xi32>
    %96 = arith.cmpi eq, %59, %95 : vector<2x16x16xi32>
    %97 = vector.shape_cast %82 : vector<2x1xi32> to vector<2x1x1xi32>
    %98 = vector.broadcast %97 : vector<2x1x1xi32> to vector<2x16x16xi32>
    %99 = arith.cmpi eq, %60, %98 : vector<2x16x16xi32>
    %100 = arith.ori %96, %99 : vector<2x16x16xi1>
    %cst_26 = arith.constant 0x7F800000 : f32
    %101 = vector.broadcast %cst_26 : f32 to vector<2x16x16xf32>
    %102 = arith.select %100, %101, %58 : vector<2x16x16xi1>, vector<2x16x16xf32>
    %cst_27 = arith.constant dense<0x7F800000> : vector<2x16xf32>
    %103 = vector.multi_reduction <minimumf>, %102, %cst_27 [2] : vector<2x16x16xf32> to vector<2x16xf32>
    %cst_28 = arith.constant dense<0x7F800000> : vector<2xf32>
    %104 = vector.multi_reduction <minimumf>, %103, %cst_28 [1] : vector<2x16xf32> to vector<2xf32>
    %105 = vector.shape_cast %104 : vector<2xf32> to vector<2x1xf32>
    %cst_29 = arith.constant 0x7F800000 : f32
    %106 = vector.broadcast %cst_29 : f32 to vector<2x1xf32>
    %107 = arith.cmpf olt, %105, %106 : vector<2x1xf32>
    %cst_30 = arith.constant 1.000000e+00 : f32
    %108 = vector.broadcast %cst_30 : f32 to vector<2x1xf32>
    %109 = arith.divf %108, %105 : vector<2x1xf32>
    %cst_31 = arith.constant 0.000000e+00 : f32
    %110 = vector.broadcast %cst_31 : f32 to vector<2x1xf32>
    %111 = arith.select %107, %109, %110 : vector<2x1xi1>, vector<2x1xf32>
    %112 = vector.shape_cast %111 : vector<2x1xf32> to vector<1x2x1xf32>
    %cst_32 = arith.constant dense<0.000000e+00> : vector<1xf32>
    %113 = vector.multi_reduction <add>, %112, %cst_32 [1, 2] : vector<1x2x1xf32> to vector<1xf32>
    %114 = vector.shape_cast %113 : vector<1xf32> to vector<1x1x1xf32>
    %115 = vector.extract %114[0, 0, 0] : f32 from vector<1x1x1xf32>
    %116 = arith.addf %93, %115 : f32
    %117 = vector.broadcast %116 : f32 to vector<1x8x128xf32>
    %c0_33 = arith.constant 0 : index
    %c0_34 = arith.constant 0 : index
    %c0_35 = arith.constant 0 : index
    %118 = vector.load %arg6[%c0_33, %c0_34, %c0_35] : memref<1x8x128xf32, #tpu.memory_space<vmem>>, vector<1x8x128xf32>
    tpu.vector_store %arg6[%c0_33, %c0_34, %c0_35], %117 {strides = array<i32>} : memref<1x8x128xf32, #tpu.memory_space<vmem>>, vector<1x8x128xf32>,
    return
  }
  func.func @transform_0(%arg0: i32, %arg1: memref<4xi32, #tpu.memory_space<smem>>, %arg2: memref<4xi32, #tpu.memory_space<smem>>) -> (i32, i32) {
    %c0_i32 = arith.constant 0 : i32
    %c0_i32_0 = arith.constant 0 : i32
    %c0_i32_1 = arith.constant 0 : i32
    return %c0_i32, %c0_i32_0 : i32, i32
  }
  func.func @transform_1(%arg0: i32, %arg1: memref<4xi32, #tpu.memory_space<smem>>, %arg2: memref<4xi32, #tpu.memory_space<smem>>) -> (i32, i32) {
    %c0_i32 = arith.constant 0 : i32
    %c0_i32_0 = arith.constant 0 : i32
    %c0_i32_1 = arith.constant 0 : i32
    return %c0_i32, %c0_i32_0 : i32, i32
  }
  func.func @transform_2(%arg0: i32, %arg1: memref<4xi32, #tpu.memory_space<smem>>, %arg2: memref<4xi32, #tpu.memory_space<smem>>) -> (i32, i32) {
    %c0_i32 = arith.constant 0 : i32
    %c0_i32_0 = arith.constant 0 : i32
    %c0_i32_1 = arith.constant 0 : i32
    return %c0_i32, %c0_i32_0 : i32, i32
  }
  func.func @transform_3(%arg0: i32, %arg1: memref<4xi32, #tpu.memory_space<smem>>, %arg2: memref<4xi32, #tpu.memory_space<smem>>) -> (i32, i32, i32) {
    %c0_i32 = arith.constant 0 : i32
    %c0_i32_0 = arith.constant 0 : i32
    %c0_i32_1 = arith.constant 0 : i32
    return %arg0, %c0_i32, %c0_i32_0 : i32, i32, i32
  }
}

</mosaic_0001>

<bundles_post_ra>
// kernel: tpu_custom_call.1
= control target key start
LH: loop header
LB: loop body
LE: loop exit
PB: predicated region body
PF: predicated region fallthrough
CT: control target
= control target key end

     0   :  { %s1200_s0 = inlined_call_operand.vmem [shape: s32[4], index: 0, kind: input, shape index: {}]   ;;  %s1201_s2 = inlined_call_operand.vmem [shape: f32[16,32], index: 2, kind: input, shape index: {}]   ;;  %s1202_s3 = inlined_call_operand.vmem [shape: s32[16,1], index: 3, kind: input, shape index: {}]   ;;  %s1203_s4 = inlined_call_operand.vmem [shape: s32[1,16], index: 4, kind: input, shape index: {}]   ;;  %s1204_s5 = inlined_call_operand.hbm [shape: f32[2,8,128], index: 5, kind: output, shape index: {}]   ;;  %s1205_s1 = inlined_call_operand.vmem [shape: s32[4], index: 1, kind: input, shape index: {}]  }
   0x1   :  { %s10_s20 = sshll.u32 %s1200_s0, 4  ;;  %s14_s23 = sshll.u32 %s1205_s1, 4  ;;  %s11_s20 = int_to_ptr.vmem [resolvable:$true] %s10_s20  ;;  %s15_s23 = int_to_ptr.vmem [resolvable:$true] %s14_s23 }
   0x2   :  { %s833_s24 = scalar_lea.vmem %s11_s20, 16  ;;  %p838_p1 = scmp.lt.s32.totalorder %s11_s20, %s11_s20 }
   0x3   :  { %p834_p0 = scmp.ne.s32.totalorder %s11_s20, %s833_s24  ;;  %p839_p2 = scmp.lt.s32.totalorder %s833_s24, %s833_s24 }
   0x5   :  { %p840_p3 = por %p839_p2, %p838_p1 }
   0x7   :  { %p841_p4 = pnand %p840_p3, %p834_p0 }
   0x9   :  { %844 = shalt.err (!%p841_p4)  }
   0xa   :  { %s923_s25 = smov [#allocation3]   ;;  %s845_s26 = scalar_lea.vmem %s15_s23, 16 }
   0xb   :  { %13 = dma.vmem_to_smem %s11_s20, 16, %s923_s25, [#allocation2] }
   0xc   :  { %p846_p5 = scmp.ne.s32.totalorder %s15_s23, %s845_s26  ;;  %p850_p6 = scmp.lt.s32.totalorder %s15_s23, %s15_s23 }
   0xd   :  { %p851_p7 = scmp.lt.s32.totalorder %s845_s26, %s845_s26 }
   0xf   :  { %p852_p8 = por %p851_p7, %p850_p6 }
  0x11   :  { %p853_p9 = pnand %p852_p8, %p846_p5 }
  0x13   :  { %856 = shalt.err (!%p853_p9)  }
  0x14   :  { %s924_s0 = smov [#allocation4]  }
  0x15   :  { %17 = dma.vmem_to_smem %s15_s23, 16, %s924_s0, [#allocation2] }
  0x16   :  { %901 = dma.done.wait [#allocation2], 32 }
  0x17   :  { %902 = vsyncadd [#allocation2], 4294967264 }
  0x18   :  { %19 = sfence }
  0x19   :  { %20 = vsyncpa [#allocation6], 0 }
  0x1a   :  { %22 = vsyncpa [#allocation6 + $0x1], 0  ;;  %s963_s1 = smov 0   ;;  %s965_s27 = smov 0  }
  0x1b   :  { %s967_s28 = smov 0   ;;  %s969_s29 = smov 0  }
  0x1c LB: > { %s984_s30 = sadd.s32 4294967295, %s921_s29   ;;  %s750_s6 = sadd.s32 4294967294, %s921_s29   ;;  %s921_s29 = sphi %s969_s29, %s1211_s29   ;;  %s917_s28 = sphi %s967_s28, %s1210_s28   ;;  %s913_s27 = sphi %s965_s27, %s1209_s27   ;;  %s909_s1 = sphi %s963_s1, %s1208_s1  }
  0x1d   : > { %s988_s7 = sadd.s32 1, %s921_s29   ;;  %s98_s8 = sadd.s32 1, %s917_s28 }
  0x1e   : > { %s95_s9 = ssub.s32 %s921_s29, %s988_s7  ;;  %p108_p10 = scmp.ne.s32.totalorder %s917_s28, %s913_s27 }
  0x1f   : > { %p96_p11 = scmp.eq.s32.totalorder %s95_s9, 0  ;;  %p109_p12 = scmp.eq.s32.totalorder %s984_s30, 1 }
  0x20   : > { %p114_p13 = scmp.ne.s32.totalorder %s913_s27, %s909_s1  ;;  %p115_p0 = scmp.eq.s32.totalorder %s750_s6, 1 }
  0x21   : > { %s999_s10 = scalar_select %p96_p11, %s917_s28, %s98_s8  }
  0x22   : > { %p1001_p1 = por %p109_p12, %p108_p10  ;;  %p1005_p2 = por %p115_p0, %p114_p13 }
  0x23   : > { %p752_p3 = scmp.ge.s32.totalorder %s921_s29, 1  ;;  %p142_p4 = scmp.lt.s32.totalorder %s921_s29, 3 }
  0x25   : > { %p143_p5 = pnand %p752_p3, %p142_p4 }
  0x26   : > { %v161_v0 = vld [vmem:[%s1201_s2] sm:$0xff] (!%p143_p5)  ;;  %v162_v1 = vld [vmem:[%s1201_s2 + $0x8] sm:$0xff] (!%p143_p5)  ;;  %vm163_vm0 = vcmask (!%p143_p5), 261120   ;;  %s1018_s17 = sshll.u32 (!%p143_p5), %s984_s30, 1  ;;  %v925_v5 = vmov (!%p143_p5), 0   ;;  %v289_v20 = vlaneseq (!%p143_p5)  ;;  %s158_s8 = sand.u32 (!%p143_p5), 1, %s913_s27  }
  0x27   : > { %146 = sbr.rel (%p143_p5) target bundleno = 1883 (0x75b), region = 32  ;;  %v774_v2 = vpack.c.bf16 (!%p143_p5), %v162_v1, %v161_v0  ;;  %vm775_vm1 = vmpackc.low (!%p143_p5), %vm163_vm0, %vm163_vm0  ;;  %v245_v3 = vmul.f32 (!%p143_p5), %v161_v0, %v161_v0  ;;  %v246_v4 = vmul.f32 (!%p143_p5), %v162_v1, %v162_v1  ;;  %771 = vmatprep.mubr.msk.f32.mxu0 (!%p143_p5), %vm163_vm0, %v161_v0  ;;  %827 = vset.pattern.permute.xlu1 (!%p143_p5), %v925_v5  ;;  %s300_s18 = sld [smem:[#allocation4 + %s1018_s17]] (!%p143_p5)  ;;  %v295_v8 = vld [vmem:[%s1202_s3] sm:$0xff] (!%p143_p5)  ;;  %v296_v9 = vld [vmem:[%s1202_s3 + $0x8] sm:$0xff] (!%p143_p5) }
  0x28   : > { %s330_s19 = sadd.s32 (!%p143_p5), 1, %s1018_s17  ;;  %828 = vset.pattern.permute.xlu0 (!%p143_p5), %v925_v5  ;;  %s299_s25 = sld [smem:[#allocation3 + %s1018_s17]] (!%p143_p5)  ;;  %v297_v22 = vld [vmem:[%s1203_s4] sm:$0x1] (!%p143_p5)  ;;  %v1042_v24 = vshrl.u32 (!%p143_p5), %v289_v20, 7  ;;  %v1066_v50 = vand.u32 (!%p143_p5), 127, %v289_v20 }
  0x29   : > { %s332_s20 = sld [smem:[#allocation4 + %s330_s19]] (!%p143_p5)  ;;  %776 = vmatprep.subr.msk.bf16.mxu0 (!%p143_p5), %vm775_vm1, %v774_v2  ;;  %v247_v6 = vsel (!%p143_p5), %vm163_vm0, %v245_v3, 0.0  ;;  %v250_v7 = vsel (!%p143_p5), %vm163_vm0, %v246_v4, 0.0  ;;  %s753_s9 = sshll.u32 (!%p143_p5), %s158_s8, 3 }
  0x2a   : > { %248 = vadd.xlane.f32.xlu0 (!%p143_p5), %v247_v6  ;;  %779 = vmatpush3.bf16.xpose.msk.msra.mxu0 (!%p143_p5), %vm775_vm1, %v774_v2  ;;  %s331_s26 = sld [smem:[#allocation3 + %s330_s19]] (!%p143_p5)  ;;  %v1045_v26 = vsub.s32 (!%p143_p5), 0, %v1042_v24  ;;  %vm367_vm1 = vcmask (!%p143_p5), 130048   ;;  %v456_v51 = vadd.s32 (!%p143_p5), 4294967288, %v1066_v50  ;;  %v1075_v54 = vsub.s32 (!%p143_p5), %v1066_v50, %v1042_v24  ;;  %s760_s14 = sshll.u32 (!%p143_p5), %s984_s30, 7 }
  0x2b   : > { %v1087_v2 = vsub.s32 (!%p143_p5), 1, %v1042_v24  ;;  %s160_s15 = scalar_lea.vmem (!%p143_p5), [#allocation5], %s753_s9  ;;  %s1158_s21 = scalar_lea.hbm (!%p143_p5), %s1204_s5, %s760_s14 }
  0x2c   : > { %v1071_v53 = vsub.s32 (!%p143_p5), %v456_v51, %v1042_v24  ;;  %s703_s16 = sshll.u32 (!%p143_p5), %s160_s15, 4  ;;  %s690_s22 = scalar_lea.sflag (!%p143_p5), [#allocation6], %s158_s8  ;;  %s1160_s16 = int_to_ptr.vmem [resolvable:$true] %s703_s16 }
  0x2d   : > { %v301_v10 = vstv (!%p143_p5), %s300_s18  ;;  %s857_s23 = scalar_lea.vmem (!%p143_p5), %s1160_s16, 128  ;;  %s926_s30 = smov (!%p143_p5), [#allocation5]  }
  0x2e   : > { %251 = vadd.xlane.f32.xlu0 %v250_v7  ;;  %vm302_vm2 = vcmp.eq.s32.totalorder %v295_v8, %v301_v10  ;;  %vm303_vm3 = vcmp.eq.s32.totalorder %v296_v9, %v301_v10  ;;  %v304_v23 = vstv %s299_s25  ;;  %p858_p6 = scmp.ne.s32.totalorder %s1160_s16, %s857_s23  ;;  %s861_s24 = sshll.u32 %s926_s30, 4  ;;  %s862_s24 = int_to_ptr.vmem [resolvable:$false] %s861_s24 }
  0x2f   : > { %v306_v11 = vsel %vm302_vm2, 1, %v925_v5  ;;  %v333_v12 = vstv %s332_s20  ;;  %v307_v13 = vsel %vm303_vm3, 1, %v925_v5  ;;  %vm305_vm6 = vcmp.eq.s32.totalorder %v297_v22, %v304_v23  ;;  %s863_s25 = scalar_lea.vmem %s862_s24, 256  ;;  %p864_p9 = scmp.lt.s32.totalorder %s1160_s16, %s862_s24 }
  0x30   : > { %309 = vperm.xlu1 %827, %v306_v11   ;;  %vm335_vm4 = vcmp.eq.s32.totalorder %v296_v9, %v333_v12  ;;  %vm334_vm5 = vcmp.eq.s32.totalorder %v295_v8, %v333_v12  ;;  %v336_v25 = vstv %s331_s26  ;;  %v316_v28 = vsel %vm305_vm6, 1, %v925_v5  ;;  %p859_p7 = pnand %p858_p6, %p1001_p1  ;;  %p865_p10 = scmp.lt.s32.totalorder %s863_s25, %s857_s23 }
  0x31   : > { %772 = vmatmul.mubr.msk.f32.vlgmr.msra.gmra.mrb[0].mxu0 %vm163_vm0, %v162_v1  ;;  %v339_v14 = vsel %vm335_vm4, 1, %v925_v5  ;;  %v338_v15 = vsel %vm334_vm5, 1, %v925_v5  ;;  %vm337_vm7 = vcmp.eq.s32.totalorder %v297_v22, %v336_v25  ;;  %v320_v30 = vrot.slane %v316_v28, %v1045_v26 }
  0x32   : > { %v348_v29 = vsel %vm337_vm7, 1, %v925_v5  ;;  %vm461_vm3 = vcmask 130112   ;;  %vm472_vm4 = vcmask 1041409   ;;  %vm475_vm5 = vcmask 123904   ;;  %p860_p8 = pneg %p859_p7  ;;  %p866_p11 = por %p865_p10, %p864_p9 }
  0x33   : > { %v352_v32 = vrot.slane %v348_v29, %v1045_v26  ;;  %vm321_vm9 = vcmp.eq.s32.totalorder %v320_v30, 1 }
  0x34   : > { %312 = vperm.xlu1 %827, %v307_v13   ;;  %p867_p12 = pnand %p866_p11, %p860_p8 }
  0x35   : > { %vm353_vm12 = vcmp.eq.s32.totalorder %v352_v32, 1 }
  0x38   : > { %344 = vperm.xlu1 %827, %v339_v14  }
  0x44   : > { %341 = vperm.xlu0 %828, %v338_v15  }
  0xaf   : > { %v310_v21 = vpop.permute.xlu1 %309 }
  0xb0   : > { %vm314_vm8 = vcmp.eq.s32.totalorder %v310_v21, 1 }
  0xb1   : > { %vm322_vm13 = vmand %vm314_vm8, %vm321_vm9 }
  0xb3   : > { %v313_v27 = vpop.permute.xlu1 %312 }
  0xb4   : > { %vm315_vm11 = vcmp.eq.s32.totalorder %v313_v27, 1 }
  0xb5   : > { %vm323_vm0 = vmand %vm315_vm11, %vm321_vm9 }
  0xb7   : > { %v249_v16 = vpop.xlane.xlu0 %248  ;;  %v345_v31 = vpop.permute.xlu1 %344 }
  0xb8   : > { %257 = vxpose.xlu1.b32.start [1/2] (short) (narrow) %v249_v16, 8  ;;  %vm347_vm14 = vcmp.eq.s32.totalorder %v345_v31, 1 }
  0xb9   : > { %vm355_vm2 = vmand %vm347_vm14, %vm353_vm12 }
  0xbb   : > { %v252_v17 = vpop.xlane.xlu0 %251 }
  0xbc   : > { %258 = vxpose.xlu1.b32.end [2/2] (short) (narrow) %v252_v17, 8 }
  0xc3   : > { %v342_v33 = vpop.permute.xlu0 %341 }
  0xc4   : > { %vm346_vm10 = vcmp.eq.s32.totalorder %v342_v33, 1 }
  0xc5   : > { %vm354_vm15 = vmand %vm346_vm10, %vm353_vm12 }
 0x104   : > { %v773_v18 = vpop.f32.mrb[0].mxu0 }
 0x105   : > { %v236_v19 = vpop.f32.mrb[1].mxu0  ;;  %v254_v34 = vmul.f32 2.0, %v773_v18 }
 0x106   : > { %v253_v35 = vmul.f32 2.0, %v236_v19 }
 0x107   : > { %v256_v37 = vsub.f32 %v252_v17, %v254_v34 }
 0x108   : > { %v255_v38 = vsub.f32 %v249_v16, %v253_v35 }
 0x138   : > { %v273_v36 = vpop.trf.xlu1 }
 0x139   : > { %v292_v39 = vrot.slane %v273_v36, %v1045_v26 }
 0x13b   : > { %v293_v40 = vadd.f32 %v292_v39, %v255_v38  ;;  %v294_v41 = vadd.f32 %v292_v39, %v256_v37 }
 0x13d   : > { %v1050_v42 = vsel %vm354_vm15, %v293_v40, inf  ;;  %v1052_v43 = vsel %vm323_vm0, %v294_v41, inf  ;;  %v1054_v44 = vsel %vm322_vm13, %v293_v40, inf  ;;  %v1056_v45 = vsel %vm355_vm2, %v294_v41, inf }
 0x13e   : > { %v371_v46 = vsel %vm367_vm1, %v1052_v43, inf  ;;  %v368_v47 = vsel %vm367_vm1, %v1054_v44, inf  ;;  %v374_v48 = vsel %vm367_vm1, %v1050_v42, inf  ;;  %v377_v49 = vsel %vm367_vm1, %v1056_v45, inf }
 0x13f   : > { %372 = vmin.xlane.f32.xlu1 %v371_v46  ;;  %369 = vmin.xlane.f32.xlu0 %v368_v47 }
 0x143   : > { %375 = vmin.xlane.f32.xlu0 %v374_v48 }
 0x147   : > { %378 = vmin.xlane.f32.xlu0 %v377_v49 }
 0x150   : > { %499 = vbcast.lane.b32.xlu1 %v1066_v50, 264 }
 0x1cc   : > { %v370_v52 = vpop.xlane.xlu0 %369  ;;  %v373_v55 = vpop.xlane.xlu1 %372 }
 0x1cd   : > { %v460_v57 = vrot.slane %v373_v55, %v1071_v53  ;;  %v455_v58 = vrot.slane %v370_v52, %v1075_v54  ;;  %vm381_vm10 = vcmp.eq.f32.partialorder %v1052_v43, %v373_v55  ;;  %vm380_vm12 = vcmp.eq.f32.partialorder %v1054_v44, %v370_v52 }
 0x1ce   : > { %v385_v12 = vsel %vm381_vm10, %v1066_v50, 16  ;;  %v384_v16 = vsel %vm380_vm12, %v1066_v50, 16 }
 0x1cf   : > { %v462_v62 = vsel %vm461_vm3, %v460_v57, %v455_v58  ;;  %v403_v13 = vsel %vm367_vm1, %v385_v12, 2147483647  ;;  %v388_v18 = vsel %vm367_vm1, %v384_v16, 2147483647 }
 0x1d0   : > { %v376_v56 = vpop.xlane.xlu0 %375  ;;  %v500_v4 = vpop.permute.xlu1 %499  ;;  %v405_v15 = vshra.s32 %v403_v13, 16  ;;  %v390_v22 = vshra.s32 %v388_v18, 16  ;;  %v404_v48 = vand.u32 65535, %v403_v13 }
 0x1d1   : > { %v466_v60 = vrot.slane %v376_v56, %v1075_v54  ;;  %vm382_vm11 = vcmp.eq.f32.partialorder %v1050_v42, %v376_v56 }
 0x1d2   : > { %v386_v14 = vsel %vm382_vm11, %v1066_v50, 16  ;;  %v407_v19 = vcvt.s32.f32 %v405_v15  ;;  %v392_v27 = vcvt.s32.f32 %v390_v22  ;;  %v406_v51 = vcvt.s32.f32 %v404_v48 }
 0x1d3   : > { %v418_v17 = vsel %vm367_vm1, %v386_v14, 2147483647 }
 0x1d4   : > { %v379_v59 = vpop.xlane.xlu0 %378  ;;  %v420_v20 = vshra.s32 %v418_v17, 16 }
 0x1d5   : > { %v470_v61 = vrot.slane %v379_v59, %v1071_v53  ;;  %vm383_vm13 = vcmp.eq.f32.partialorder %v1056_v45, %v379_v59 }
 0x1d6   : > { %v387_v21 = vsel %vm383_vm13, %v1066_v50, 16  ;;  %v422_v25 = vcvt.s32.f32 %v420_v20 }
 0x1d7   : > { %v471_v63 = vsel %vm461_vm3, %v470_v61, %v466_v60  ;;  %v433_v23 = vsel %vm367_vm1, %v387_v21, 2147483647 }
 0x1d8   : > { %v473_v0 = vsel %vm472_vm4, %v471_v63, %v462_v62  ;;  %v435_v28 = vshra.s32 %v433_v23, 16  ;;  %v434_v60 = vand.u32 65535, %v433_v23 }
 0x1d9   : > { %v476_v1 = vsel %vm475_vm5, %v473_v0, inf }
 0x1da   : > { %477 = vmin.xlane.f32.xlu0 %v476_v1  ;;  %v437_v29 = vcvt.s32.f32 %v435_v28  ;;  %v436_v0 = vcvt.s32.f32 %v434_v60 }
 0x1f0   : > { %495 = vbcast.lane.b32.xlu0 %v1066_v50, 256 }
 0x267   : > { %v1089_v3 = vpop.xlane.xlu0 %477 }
 0x268   : > { %v483_v5 = vrot.slane %v1089_v3, %v1045_v26  ;;  %v487_v6 = vrot.slane %v1089_v3, %v1087_v2  ;;  %829 = vrcp.f32 %v1089_v3 }
 0x26a   : > { %vm491_vm6 = vcmp.eq.f32.partialorder %v373_v55, %v483_v5  ;;  %vm490_vm7 = vcmp.eq.f32.partialorder %v370_v52, %v483_v5  ;;  %vm493_vm8 = vcmp.eq.f32.partialorder %v379_v59, %v487_v6  ;;  %vm492_vm9 = vcmp.eq.f32.partialorder %v376_v56, %v487_v6 }
 0x26b   : > { %v496_v7 = vpop.permute.xlu0 %495  ;;  %v502_v8 = vsel %vm491_vm6, %v500_v4, 16  ;;  %v504_v10 = vsel %vm493_vm8, %v500_v4, 16  ;;  %v389_v55 = vand.u32 65535, %v388_v18  ;;  %v419_v59 = vand.u32 65535, %v418_v17 }
 0x26c   : > { %509 = vperm.xlu0 %828, %v502_v8   ;;  %v501_v9 = vsel %vm490_vm7, %v496_v7, 16  ;;  %v503_v11 = vsel %vm492_vm9, %v496_v7, 16 }
 0x26d   : > { %506 = vperm.xlu1 %827, %v501_v9   ;;  %v391_v58 = vcvt.s32.f32 %v389_v55  ;;  %v421_v63 = vcvt.s32.f32 %v419_v59 }
 0x270   : > { %515 = vperm.xlu0 %828, %v504_v10  }
 0x271   : > { %512 = vperm.xlu1 %827, %v503_v11  }
 0x28f   : > { %408 = vmin.xlane.f32.xlu0 %v407_v19 }
 0x293   : > { %423 = vmin.xlane.f32.xlu0 %v422_v25 }
 0x295   : > { %393 = vmin.xlane.f32.xlu1 %v392_v27 }
 0x299   : > { %438 = vmin.xlane.f32.xlu1 %v437_v29 }
 0x2eb   : > { %v510_v30 = vpop.permute.xlu0 %509 }
 0x2ec   : > { %v507_v31 = vpop.permute.xlu1 %506  ;;  %v524_v32 = vrot.slane %v510_v30, %v1071_v53 }
 0x2ed   : > { %v520_v33 = vrot.slane %v507_v31, %v1075_v54 }
 0x2ef   : > { %v516_v34 = vpop.permute.xlu0 %515  ;;  %v525_v38 = vsel %vm461_vm3, %v524_v32, %v520_v33 }
 0x2f0   : > { %v533_v35 = vrot.slane %v516_v34, %v1071_v53  ;;  %v513_v36 = vpop.permute.xlu1 %512 }
 0x2f1   : > { %v529_v37 = vrot.slane %v513_v36, %v1075_v54 }
 0x2f3   : > { %v534_v39 = vsel %vm461_vm3, %v533_v35, %v529_v37 }
 0x2f4   : > { %v535_v40 = vsel %vm472_vm4, %v534_v39, %v525_v38 }
 0x2f5   : > { %v536_v41 = vsel %vm475_vm5, %v535_v40, 2147483647 }
 0x2f6   : > { %v538_v46 = vshra.s32 %v536_v41, 16  ;;  %v537_v5 = vand.u32 65535, %v536_v41 }
 0x2f8   : > { %v540_v47 = vcvt.s32.f32 %v538_v46  ;;  %v539_v7 = vcvt.s32.f32 %v537_v5 }
 0x2fa   : > { %541 = vmin.xlane.f32.xlu0 %v540_v47 }
 0x31c   : > { %v409_v49 = vpop.xlane.xlu0 %408 }
 0x31d   : > { %vm410_vm14 = vcmp.eq.f32.partialorder %v407_v19, %v409_v49  ;;  %v415_v10 = vcvt.f32.s32 %v409_v49 }
 0x31e   : > { %v411_v52 = vsel %vm410_vm14, %v406_v51, inf }
 0x31f   : > { %412 = vmin.xlane.f32.xlu0 %v411_v52  ;;  %v416_v13 = vshll.u32 %v415_v10, 16 }
 0x320   : > { %v424_v56 = vpop.xlane.xlu0 %423 }
 0x321   : > { %vm425_vm0 = vcmp.eq.f32.partialorder %v422_v25, %v424_v56  ;;  %v430_v25 = vcvt.f32.s32 %v424_v56 }
 0x322   : > { %v394_v57 = vpop.xlane.xlu1 %393  ;;  %v426_v1 = vsel %vm425_vm0, %v421_v63, inf  ;;  %v364_v63 = vadd.s32 8, %v1042_v24 }
 0x323   : > { %vm395_vm15 = vcmp.eq.f32.partialorder %v392_v27, %v394_v57  ;;  %v400_v11 = vcvt.f32.s32 %v394_v57  ;;  %v431_v30 = vshll.u32 %v430_v25, 16 }
 0x324   : > { %v396_v61 = vsel %vm395_vm15, %v391_v58, inf }
 0x325   : > { %397 = vmin.xlane.f32.xlu1 %v396_v61  ;;  %v401_v15 = vshll.u32 %v400_v11, 16 }
 0x326   : > { %v439_v62 = vpop.xlane.xlu1 %438 }
 0x327   : > { %vm440_vm2 = vcmp.eq.f32.partialorder %v437_v29, %v439_v62  ;;  %v445_v27 = vcvt.f32.s32 %v439_v62 }
 0x328   : > { %v441_v4 = vsel %vm440_vm2, %v436_v0, inf }
 0x329   : > { %427 = vmin.xlane.f32.xlu1 %v426_v1  ;;  %442 = vmin.xlane.f32.xlu0 %v441_v4  ;;  %v446_v31 = vshll.u32 %v445_v27, 16 }
 0x387   : > { %v542_v6 = vpop.xlane.xlu0 %541 }
 0x388   : > { %vm543_vm6 = vcmp.eq.f32.partialorder %v540_v47, %v542_v6  ;;  %v548_v34 = vcvt.f32.s32 %v542_v6 }
 0x389   : > { %v544_v8 = vsel %vm543_vm6, %v539_v7, inf }
 0x38a   : > { %545 = vmin.xlane.f32.xlu1 %v544_v8  ;;  %v549_v38 = vshll.u32 %v548_v34, 16 }
 0x3ac   : > { %v413_v9 = vpop.xlane.xlu0 %412 }
 0x3ad   : > { %v414_v12 = vcvt.f32.s32 %v413_v9 }
 0x3af   : > { %v417_v16 = vadd.s32 %v416_v13, %v414_v12 }
 0x3b1   : > { %v559_v19 = vrot.slane %v417_v16, %v1071_v53 }
 0x3b2   : > { %v398_v14 = vpop.xlane.xlu1 %397 }
 0x3b3   : > { %v399_v17 = vcvt.f32.s32 %v398_v14 }
 0x3b5   : > { %v402_v18 = vadd.s32 %v401_v15, %v399_v17 }
 0x3b6   : > { %v428_v22 = vpop.xlane.xlu1 %427  ;;  %v443_v23 = vpop.xlane.xlu0 %442 }
 0x3b7   : > { %v555_v20 = vrot.slane %v402_v18, %v1075_v54  ;;  %v429_v28 = vcvt.f32.s32 %v428_v22  ;;  %v444_v29 = vcvt.f32.s32 %v443_v23 }
 0x3b9   : > { %v560_v21 = vsel %vm461_vm3, %v559_v19, %v555_v20  ;;  %v432_v32 = vadd.s32 %v431_v30, %v429_v28  ;;  %v447_v33 = vadd.s32 %v446_v31, %v444_v29 }
 0x3bb   : > { %v564_v35 = vrot.slane %v432_v32, %v1075_v54  ;;  %v568_v36 = vrot.slane %v447_v33, %v1071_v53 }
 0x3bd   : > { %v569_v40 = vsel %vm461_vm3, %v568_v36, %v564_v35 }
 0x3be   : > { %v570_v46 = vsel %vm472_vm4, %v569_v40, %v560_v21 }
 0x417   : > { %v546_v37 = vpop.xlane.xlu1 %545 }
 0x418   : > { %v547_v39 = vcvt.f32.s32 %v546_v37 }
 0x41a   : > { %v550_v41 = vadd.s32 %v549_v38, %v547_v39 }
 0x41c   : > { %vm551_vm7 = vcmp.eq.s32.totalorder %v1066_v50, %v550_v41  ;;  %v606_v0 = vrot.slane %v550_v41, %v1045_v26  ;;  %v610_v5 = vrot.slane %v550_v41, %v1087_v2 }
 0x41d   : > { %v571_v47 = vsel %vm551_vm7, %v570_v46, 16  ;;  %vm587_vm7 = vcmp.lt.f32.partialorder %v1089_v3, inf }
 0x41e   : > { %v572_v48 = vsel %vm475_vm5, %v571_v47, 2147483647  ;;  %vm612_vm9 = vcmp.eq.s32.totalorder %v364_v63, %v606_v0  ;;  %vm611_vm13 = vcmp.eq.s32.totalorder %v1042_v24, %v606_v0  ;;  %vm614_vm15 = vcmp.eq.s32.totalorder %v364_v63, %v610_v5 }
 0x41f   : > { %v574_v49 = vshra.s32 %v572_v48, 16  ;;  %v573_v52 = vand.u32 65535, %v572_v48  ;;  %vm613_vm2 = vcmp.eq.s32.totalorder %v1042_v24, %v610_v5 }
 0x421   : > { %v576_v51 = vcvt.s32.f32 %v574_v49  ;;  %v575_v56 = vcvt.s32.f32 %v573_v52 }
 0x423   : > { %577 = vmin.xlane.f32.xlu0 %v576_v51 }
 0x4b0   : > { %v578_v55 = vpop.xlane.xlu0 %577 }
 0x4b1   : > { %vm579_vm8 = vcmp.eq.f32.partialorder %v576_v51, %v578_v55  ;;  %v584_v58 = vcvt.f32.s32 %v578_v55 }
 0x4b2   : > { %v580_v57 = vsel %vm579_vm8, %v575_v56, inf  ;;  %vm591_vm8 = vcmask 1024  }
 0x4b3   : > { %581 = vmin.xlane.f32.xlu1 %v580_v57  ;;  %v585_v60 = vshll.u32 %v584_v58, 16 }
 0x540   : > { %v582_v59 = vpop.xlane.xlu1 %581 }
 0x541   : > { %v583_v61 = vcvt.f32.s32 %v582_v59 }
 0x543   : > { %v586_v62 = vadd.s32 %v585_v60, %v583_v61 }
 0x545   : > { %v618_v1 = vrot.slane %v586_v62, %v1045_v26  ;;  %v622_v4 = vrot.slane %v586_v62, %v1087_v2 }
 0x547   : > { %vm623_vm10 = vcmp.eq.s32.totalorder %v1066_v50, %v618_v1  ;;  %vm624_vm11 = vcmp.eq.s32.totalorder %v1066_v50, %v622_v4  ;;  %v830_v50 = vpop.eup %829 }
 0x548   : > { %vm626_vm12 = vmor %vm612_vm9, %vm623_vm10  ;;  %v590_v10 = vsel %vm587_vm7, %v830_v50, 0.0 }
 0x549   : > { %v630_v6 = vsel %vm626_vm12, inf, %v1052_v43  ;;  %vm625_vm14 = vmor %vm611_vm13, %vm623_vm10  ;;  %v592_v24 = vsel %vm591_vm8, %v590_v10, 0.0 }
 0x54a   : > { %v636_v7 = vsel %vm367_vm1, %v630_v6, inf  ;;  %v629_v26 = vsel %vm625_vm14, inf, %v1054_v44  ;;  %vm628_vm0 = vmor %vm614_vm15, %vm624_vm11 }
 0x54b   : > { %637 = vmin.xlane.f32.xlu1 %v636_v7  ;;  %v633_v2 = vsel %vm367_vm1, %v629_v26, inf  ;;  %v632_v8 = vsel %vm628_vm0, inf, %v1056_v45  ;;  %vm627_vm6 = vmor %vm613_vm2, %vm624_vm11 }
 0x54c   : > { %634 = vmin.xlane.f32.xlu0 %v633_v2  ;;  %v631_v9 = vsel %vm627_vm6, inf, %v1050_v42  ;;  %v642_v43 = vsel %vm367_vm1, %v632_v8, inf }
 0x54d   : > { %v639_v44 = vsel %vm367_vm1, %v631_v9, inf }
 0x54f   : > { %643 = vmin.xlane.f32.xlu1 %v642_v43 }
 0x550   : > { %640 = vmin.xlane.f32.xlu0 %v639_v44 }
 0x553   : > { %593 = vadd.xlane.f32.xlu1 %v592_v24 }
 0x5d8   : > { %v638_v11 = vpop.xlane.xlu1 %637 }
 0x5d9   : > { %v635_v45 = vpop.xlane.xlu0 %634  ;;  %v656_v12 = vrot.slane %v638_v11, %v1071_v53 }
 0x5da   : > { %v652_v13 = vrot.slane %v635_v45, %v1075_v54 }
 0x5dc   : > { %v644_v42 = vpop.xlane.xlu1 %643  ;;  %v657_v17 = vsel %vm461_vm3, %v656_v12, %v652_v13 }
 0x5dd   : > { %v665_v14 = vrot.slane %v644_v42, %v1071_v53  ;;  %v641_v15 = vpop.xlane.xlu0 %640 }
 0x5de   : > { %v661_v3 = vrot.slane %v641_v15, %v1075_v54 }
 0x5e0   : > { %v594_v16 = vpop.xlane.xlu1 %593  ;;  %v666_v18 = vsel %vm461_vm3, %v665_v14, %v661_v3 }
 0x5e1   : > { %v595_v19 = vrot.slane %v594_v16, 4  ;;  %v667_v20 = vsel %vm472_vm4, %v666_v18, %v657_v17 }
 0x5e2   : > { %v669_v21 = vsel %vm475_vm5, %v667_v20, inf }
 0x5e3   : > { %v596_v22 = vadd.f32 %v595_v19, %v594_v16  ;;  %670 = vmin.xlane.f32.xlu0 %v669_v21 }
 0x5e5   : > { %v597_v23 = vrot.slane %v596_v22, 2 }
 0x5e7   : > { %v598_v25 = vadd.f32 %v597_v23, %v596_v22 }
 0x5e9   : > { %v599_v27 = vrot.slane %v598_v25, 1 }
 0x5eb   : > { %v600_v28 = vadd.f32 %v599_v27, %v598_v25 }
 0x5ed   : > { %780 = vpush %v600_v28 }
 0x61e   : > { %s781_s13 = spop %780 }
 0x670   : > { %v671_v53 = vpop.xlane.xlu0 %670 }
 0x671   : > { %831 = vrcp.f32 %v671_v53  ;;  %vm672_vm1 = vcmp.lt.f32.partialorder %v671_v53, inf }
 0x67b   : > { %v832_v54 = vpop.eup %831 }
 0x67c   : > { %v675_v29 = vsel %vm672_vm1, %v832_v54, 0.0 }
 0x67d   : > { %v676_v30 = vsel %vm591_vm8, %v675_v29, 0.0 }
 0x67e   : > { %677 = vadd.xlane.f32.xlu0 %v676_v30 }
 0x70b   : > { %v678_v31 = vpop.xlane.xlu0 %677 }
 0x70c   : > { %v679_v32 = vrot.slane %v678_v31, 4 }
 0x70e   : > { %v680_v33 = vadd.f32 %v679_v32, %v678_v31 }
 0x710   : > { %v681_v34 = vrot.slane %v680_v33, 2 }
 0x712   : > { %v682_v35 = vadd.f32 %v681_v34, %v680_v33 }
 0x714   : > { %v683_v36 = vrot.slane %v682_v35, 1 }
 0x716   : > { %v684_v37 = vadd.f32 %v683_v36, %v682_v35 }
 0x718   : > { %782 = vpush %v684_v37 }
 0x749   : > { %s783_s17 = spop %782 }
 0x74a   : > { %s686_s18 = sadd.f32 %s783_s17, %s781_s13 }
 0x74c   : > { %v687_v38 = vstv %s686_s18 }
 0x74d   : > { %688 = vst [vmem:[%s160_s15] sm:$0xff] %v687_v38 }
 0x74e   : > { %870 = shalt.err (!%p867_p12)
}
 0x74f   : > { %s871_s26 = scalar_lea.hbm %s1158_s21, 128  ;;  %s875_s8 = scalar_lea.hbm %s1204_s5, 256 }
 0x750   : > { %p872_p13 = scmp.ne.s32.totalorder %s1158_s21, %s871_s26  ;;  %p876_p4 = scmp.lt.u32.totalorder %s1158_s21, %s1204_s5 }
 0x751   : > { %p877_p5 = scmp.lt.u32.totalorder %s875_s8, %s871_s26  ;;  %p879_p7 = scmp.lt.u32.totalorder %s871_s26, %s1158_s21 }
 0x752   : > { %p873_p0 = pnand %p872_p13, %p1001_p1 }
 0x753   : > { %p878_p6 = por %p877_p5, %p876_p4 }
 0x754   : > { %p874_p3 = pneg %p873_p0 }
 0x755   : > { %p880_p8 = por %p879_p7, %p878_p6 }
 0x757   : > { %p881_p9 = pnand %p880_p8, %p874_p3 }
 0x759   : > { %884 = shalt.err (!%p881_p9)
}
 0x75a   : > { %784 = dma.vmem_to_hbm [thread:$0]  (%p1001_p1), %s1160_s16, 128, %s1158_s21, %s690_s22  }
 0x75b PF: > { %p790_p10 = scmp.ge.s32.totalorder %s921_s29, 2  ;;  %s715_s14 = sand.u32 1, %s909_s1  }
 0x75c   : > { %s716_s15 = scalar_lea.sflag [#allocation6], %s715_s14 }
 0x75d   : > { %p787_p11 = pnand %p790_p10, %p1005_p2 }
 0x75f   : > { %904 = dma.done.wait (!%p787_p11), %s716_s15, 128  }
 0x760   : > { %906 = vsyncadd (!%p787_p11), %s716_s15, 4294967168  ;;  %p25_p12 = scmp.ge.s32.totalorder %s988_s7, 4   ;;  %s1208_s1 = smov %s913_s27 }
 0x761   : > { %s1209_s27 = smov %s917_s28  ;;  %s1210_s28 = smov %s999_s10 }
 0x762   : > { %s1211_s29 = smov %s988_s7  ;;  %27 = sbr.rel (!%p25_p12) target bundleno = 28 (0x1c), region = 64 }
 0x769   :  { %721 = vsyncpa [#allocation6], 1 }
 0x76a   :  { %723 = vsyncpa [#allocation6 + $0x1], 1 }

</bundles_post_ra>
